<compile_context>
chip_gen: v6e
topology: v6e:2x2x1
jax: 0.10.0
libtpu: 0.0.40
codegen_flags: <defaults>
</compile_context>

<pallas_src>
import functools

import jax
import jax.numpy as jnp
from jax.experimental import pallas as pl
from jax.experimental.pallas import tpu as pltpu


def _round_up(x, m):
    return ((x + m - 1) // m) * m


def _choose_tile_hw(D, C, HW, requested=None):
    """Largest lane tile (multiple of 128) that fits a per-generation VMEM budget."""
    try:
        vmem_cap = int(pltpu.get_tpu_info().vmem_capacity_bytes)
    except Exception:  # pragma: no cover - conservative fallback (v7x per-TC VMEM)
        vmem_cap = 64 << 20
    vmem_cap = max(vmem_cap, 32 << 20)
    budget = min(vmem_cap // 2, 64 << 20)        # leave headroom for the compiler
    # f32 words per pixel column:
    #   2 streamed inputs x 2 pipeline buffers x D sublanes
    #   + ~6 live (C, tile) temporaries of the distance/softmax math
    #   + misc (accumulator, norms, output block)
    words_per_col = 4 * D + 6 * C + 16
    tile = (budget // (4 * words_per_col)) // 128 * 128
    tile = min(tile, 8192, _round_up(HW, 128))
    if requested is not None:
        tile = min(tile, _round_up(requested, 128))
    tile = max(tile, 128)
    vmem_limit = int(min(vmem_cap - (2 << 20), max(budget + (8 << 20), 32 << 20)))
    return tile, vmem_limit


def _kl_kernel(pred_ref, tgt_ref, emb_ref, embsq_ref, out_ref, acc_ref,
               *, hw, tile_hw, num_t, tiles_per_split):
    """One grid step processes a (D, tile_hw) slab of pixels of one batch elem.

    pred_ref, tgt_ref : (D, tile_hw)  stream dtype   pixels on lanes, features on sublanes
    emb_ref           : (C, D)        stream dtype   embedding table (resident)
    embsq_ref         : (C, 1)        f32            ||e_c||^2
    out_ref           : (1, tile_hw)  f32            per-(batch, split) KL partials
    acc_ref           : (1, tile_hw)  f32  scratch   class-reduced KL accumulator
    """
    s_idx = pl.program_id(1)
    t_idx = pl.program_id(2)

    @pl.when(t_idx == 0)
    def _():
        acc_ref[...] = jnp.zeros_like(acc_ref)

    emb = emb_ref[...]        # (C, D)
    emb_sq = embsq_ref[...]   # (C, 1) f32

    def neg_sqrt_dist(x_ref):     # -> (C, tile_hw) f32
        x = x_ref[...]                                       # (D, tile), stream dtype
        xf = x.astype(jnp.float32)
        x_sq = jnp.sum(xf * xf, axis=0, keepdims=True)       # (1, tile)
        d2 = emb_sq - 2.0 * jnp.dot(emb, x, preferred_element_type=jnp.float32) + x_sq
        # clamp tiny negative values from cancellation before sqrt
        return -jnp.sqrt(jnp.maximum(d2, 0.0))

    # TODO(synk): the two matmuls could be fused into one MXU call by stacking
    # pred/tgt along lanes; left split until a bundle dump shows MXU push/drain
    # on the critical path (MXU is not the binding unit at these sizes).
    p = neg_sqrt_dist(pred_ref)    # (C, tile)
    t = neg_sqrt_dist(tgt_ref)     # (C, tile)

    # Algebraic KL over the class axis (axis 0):
    #   kl_col = sum_C[exp(t_sh) * (t_sh - p_sh)] / sum_t + log(sum_p) - log(sum_t)
    # (uses sum_C q == 1); all class-axis reductions ride the XLU and the
    # softmax normalization becomes a single (1, tile) divide.
    p_sh = p - jnp.max(p, axis=0, keepdims=True)
    t_sh = t - jnp.max(t, axis=0, keepdims=True)
    sum_p = jnp.sum(jnp.exp(p_sh), axis=0, keepdims=True)            # (1, tile)
    t_exp = jnp.exp(t_sh)
    sum_t = jnp.sum(t_exp, axis=0, keepdims=True)                    # (1, tile)
    w = jnp.sum(t_exp * (t_sh - p_sh), axis=0, keepdims=True)        # (1, tile)
    # exact divide on a (1, tile) slab: negligible cost, no approx-vrcp scaling
    kl_col = w / sum_t + (jnp.log(sum_p) - jnp.log(sum_t))           # (1, tile)

    if hw % tile_hw != 0:
        # Ragged tail: only the globally-last pixel tile needs the column mask
        # (out-of-bounds lanes hold garbage/NaN and are zeroed by the select).
        last = num_t - 1
        gt = s_idx * tiles_per_split + t_idx   # global tile index

        @pl.when(gt == last)
        def _():
            col = last * tile_hw + jax.lax.broadcasted_iota(
                jnp.int32, (1, tile_hw), 1)
            acc_ref[...] += jnp.where(col < hw, kl_col, 0.0)

        @pl.when(gt != last)
        def _():
            acc_ref[...] += kl_col
    else:
        acc_ref[...] += kl_col

    @pl.when(t_idx == tiles_per_split - 1)
    def _():
        out_ref[...] = acc_ref[...]


def embedding_distribution_loss(prediction, target, embedding_weight,
                                kl_weight=1.0, tile_hw=None):
    """prediction/target: (N, D, H, W); embedding_weight: (C, D)."""
    N, D, H, W = prediction.shape
    C, D2 = embedding_weight.shape
    assert D == D2, "embedding dim mismatch"
    HW = H * W

    # Stream the inputs in their native floating dtype (no forced f32 HBM copy);
    # elementwise math inside the kernel is always f32.
    if prediction.dtype in (jnp.dtype(jnp.float32), jnp.dtype(jnp.bfloat16),
                            jnp.dtype(jnp.float16)):
        stream_dtype = prediction.dtype
    else:
        stream_dtype = jnp.float32

    tile, vmem_limit = _choose_tile_hw(D, C, HW, requested=tile_hw)
    num_t = -(-HW // tile)                     # ceil-div; trailing tile may be partial

    # (N, D, HW) reshape is layout-free; no pad, no transpose.
    pred3 = prediction.reshape(N, D, HW).astype(stream_dtype)
    tgt3 = target.reshape(N, D, HW).astype(stream_dtype)
    emb = embedding_weight.astype(stream_dtype)                       # (C, D)
    emb_sq = jnp.sum(embedding_weight.astype(jnp.float32) ** 2,
                     axis=1, keepdims=True)                           # (C, 1) f32

    # v7x has 2 TensorCores: when the batch axis alone cannot feed both, split
    # the pixel-tile axis into a second 'parallel' grid axis (only when it
    # divides evenly, to keep every tile index in-bounds).
    S = 2 if (N == 1 and num_t >= 2 and num_t % 2 == 0) else 1
    T = num_t // S

    kernel = functools.partial(_kl_kernel, hw=HW, tile_hw=tile,
                               num_t=num_t, tiles_per_split=T)

    stream_spec = pl.BlockSpec((None, D, tile), lambda n, s, t: (n, 0, s * T + t))

    partials = pl.pallas_call(
        kernel,
        out_shape=jax.ShapeDtypeStruct((N * S, 1, tile), jnp.float32),
        grid_spec=pltpu.PrefetchScalarGridSpec(
            num_scalar_prefetch=0,
            grid=(N, S, T),
            in_specs=[
                stream_spec,
                stream_spec,
                pl.BlockSpec((C, D), lambda n, s, t: (0, 0)),
                pl.BlockSpec((C, 1), lambda n, s, t: (0, 0)),
            ],
            out_specs=pl.BlockSpec((None, 1, tile),
                                   lambda n, s, t: (n * S + s, 0, 0)),
            scratch_shapes=[pltpu.VMEM((1, tile), jnp.float32)],
        ),
        compiler_params=pltpu.CompilerParams(
            dimension_semantics=("parallel", "parallel", "arbitrary"),
            vmem_limit_bytes=vmem_limit),
    )(pred3, tgt3, emb, emb_sq)

    # Single cross-lane collapse of the (N*S, 1, tile) partials, once, outside.
    kl_sum = jnp.sum(partials)

    # Normalization matches PyTorch: N, C = log_softmax(prediction).shape[:2]
    kl_div = kl_sum / (N * C)
    kl_div_loss = kl_div * kl_weight
    loss = kl_div_loss
    # Return device scalars (no host sync); round/format on the host if needed.
    loss_dict = {"loss": loss, "kl_div": kl_div, "kl_div_loss": kl_div_loss}
    # TODO(synk): distance_criterion is None in this synthetic setup; if given,
    # its loss would be added here (it is an arbitrary user-supplied callable).
    return loss, loss_dict


def _reference(prediction, target, embedding_weight, kl_weight=1.0):
    """Pure-JAX reference mirroring the PyTorch forward."""
    def emb_dist(x):
        n, d, h, w = x.shape
        xf = jnp.transpose(x, (0, 2, 3, 1)).reshape(-1, d)
        d2 = (jnp.sum(xf ** 2, axis=1, keepdims=True)
              - 2.0 * xf @ embedding_weight.T
              + jnp.sum(embedding_weight ** 2, axis=1)[None, :])
        c = embedding_weight.shape[0]
        return jnp.transpose(d2.reshape(n, h, w, c), (0, 3, 1, 2))

    p = jnp.sqrt(jnp.maximum(emb_dist(prediction), 0.0))
    t = jnp.sqrt(jnp.maximum(emb_dist(target), 0.0))
    log_p = jax.nn.log_softmax(-p, axis=1)
    log_q = jax.nn.log_softmax(-t, axis=1)
    q = jnp.exp(log_q)
    kl = jnp.sum(q * (log_q - log_p))
    n, c = log_p.shape[:2]
    return kl / (n * c) * kl_weight


if __name__ == "__main__":
    def _check(N, D, H, W, C, tile_hw=None):
        key = jax.random.PRNGKey(0)
        k1, k2, k3 = jax.random.split(key, 3)
        prediction = jax.random.normal(k1, (N, D, H, W), dtype=jnp.float32)
        target = jax.random.normal(k2, (N, D, H, W), dtype=jnp.float32)
        embedding_weight = jax.random.normal(k3, (C, D), dtype=jnp.float32)

        loss, _ = embedding_distribution_loss(
            prediction, target, embedding_weight, kl_weight=1.0, tile_hw=tile_hw)
        jax.block_until_ready(loss)

        ref = _reference(prediction, target, embedding_weight, kl_weight=1.0)
        assert jnp.allclose(loss, ref, rtol=1e-3, atol=1e-5), (
            (N, D, H, W, C, tile_hw), loss, ref)

    # Base case: shapes consistent with the module (N, D, H, W) + (C, D) table.
    _check(2, 32, 16, 16, 16)
    # Ragged pixel tail + multi-tile accumulation (no-pad path, masked last tile).
    _check(2, 32, 12, 23, 16, tile_hw=128)
    # N == 1: pixel-tile axis split across a second parallel grid axis (2 TCs).
    _check(1, 32, 16, 32, 16, tile_hw=128)

    print("KERNEL_OK")
</pallas_src>

<mosaic_0001>
module attributes {stable_mosaic.version = 11 : i64} {
  func.func @_kl_kernel(%arg0: i32, %arg1: i32, %arg2: i32, %arg3: memref<1x32x256xf32, #tpu.memory_space<vmem>>, %arg4: memref<1x32x256xf32, #tpu.memory_space<vmem>>, %arg5: memref<16x32xf32, #tpu.memory_space<vmem>>, %arg6: memref<16x1xf32, #tpu.memory_space<vmem>>, %arg7: memref<1x1x256xf32, #tpu.memory_space<vmem>>, %arg8: memref<1x256xf32, #tpu.memory_space<vmem>>) attributes {dimension_semantics = [#tpu.dimension_semantics<parallel>, #tpu.dimension_semantics<parallel>, #tpu.dimension_semantics<arbitrary>], iteration_bounds = array<i64: 2, 1, 1>, scalar_prefetch = 0 : i64, scratch_operands = 1 : i64, tpu.core_type = #tpu.core_type<tc>, window_params = [{transform_indices = @transform_0, window_bounds = array<i64: 1, 32, 256>}, {transform_indices = @transform_1, window_bounds = array<i64: 1, 32, 256>}, {pipeline_mode = #tpu.pipeline_mode<synchronous>, transform_indices = @transform_2, window_bounds = array<i64: 16, 32>}, {pipeline_mode = #tpu.pipeline_mode<synchronous>, transform_indices = @transform_3, window_bounds = array<i64: 16, 1>}, {transform_indices = @transform_4, window_bounds = array<i64: 1, 1, 256>}]} {
    %c0_i32 = arith.constant 0 : i32
    %0 = arith.cmpi eq, %arg2, %c0_i32 : i32
    %1 = arith.extui %0 : i1 to i32
    %c0_i32_0 = arith.constant 0 : i32
    %2 = arith.cmpi ne, %1, %c0_i32_0 : i32
    scf.if %2 {
      %cst_30 = arith.constant 0.000000e+00 : f32
      %68 = vector.broadcast %cst_30 : f32 to vector<1x256xf32>
      %c0_31 = arith.constant 0 : index
      %c0_32 = arith.constant 0 : index
      %69 = vector.load %arg8[%c0_31, %c0_32] : memref<1x256xf32, #tpu.memory_space<vmem>>, vector<1x256xf32>
      tpu.vector_store %arg8[%c0_31, %c0_32], %68 {strides = array<i32>} : memref<1x256xf32, #tpu.memory_space<vmem>>, vector<1x256xf32>,
    } else {
    }
    %c0 = arith.constant 0 : index
    %c0_1 = arith.constant 0 : index
    %3 = vector.load %arg5[%c0, %c0_1] : memref<16x32xf32, #tpu.memory_space<vmem>>, vector<16x32xf32>
    %c0_2 = arith.constant 0 : index
    %c0_3 = arith.constant 0 : index
    %4 = vector.load %arg6[%c0_2, %c0_3] : memref<16x1xf32, #tpu.memory_space<vmem>>, vector<16x1xf32>
    %c0_4 = arith.constant 0 : index
    %c0_5 = arith.constant 0 : index
    %c0_6 = arith.constant 0 : index
    %5 = vector.load %arg3[%c0_4, %c0_5, %c0_6] : memref<1x32x256xf32, #tpu.memory_space<vmem>>, vector<1x32x256xf32>
    %6 = vector.shape_cast %5 : vector<1x32x256xf32> to vector<32x256xf32>
    %7 = arith.mulf %6, %6 : vector<32x256xf32>
    %cst = arith.constant dense<0.000000e+00> : vector<256xf32>
    %8 = vector.multi_reduction <add>, %7, %cst [0] : vector<32x256xf32> to vector<256xf32>
    %9 = vector.shape_cast %8 : vector<256xf32> to vector<1x256xf32>
    %cst_7 = arith.constant dense<0.000000e+00> : vector<16x256xf32>
    %10 = tpu.matmul %3, %6, %cst_7 {dimension_numbers = #tpu.dot_dimension_numbers<[1], [0], [0], [1], [0, 0, 1, 1], [], []>} : vector<16x32xf32>, vector<32x256xf32>, vector<16x256xf32> -> vector<16x256xf32>
    %cst_8 = arith.constant 2.000000e+00 : f32
    %11 = vector.broadcast %cst_8 : f32 to vector<16x256xf32>
    %12 = arith.mulf %11, %10 : vector<16x256xf32>
    %13 = vector.broadcast %4 : vector<16x1xf32> to vector<16x256xf32>
    %14 = arith.subf %13, %12 : vector<16x256xf32>
    %15 = vector.broadcast %9 : vector<1x256xf32> to vector<16x256xf32>
    %16 = arith.addf %14, %15 : vector<16x256xf32>
    %cst_9 = arith.constant 0.000000e+00 : f32
    %17 = vector.broadcast %cst_9 : f32 to vector<16x256xf32>
    %18 = arith.maximumf %16, %17 : vector<16x256xf32>
    %19 = math.sqrt %18 : vector<16x256xf32>
    %cst_10 = arith.constant 0.000000e+00 : f32
    %20 = vector.broadcast %cst_10 : f32 to vector<16x256xf32>
    %21 = arith.subf %20, %19 : vector<16x256xf32>
    %c0_11 = arith.constant 0 : index
    %c0_12 = arith.constant 0 : index
    %c0_13 = arith.constant 0 : index
    %22 = vector.load %arg4[%c0_11, %c0_12, %c0_13] : memref<1x32x256xf32, #tpu.memory_space<vmem>>, vector<1x32x256xf32>
    %23 = vector.shape_cast %22 : vector<1x32x256xf32> to vector<32x256xf32>
    %24 = arith.mulf %23, %23 : vector<32x256xf32>
    %cst_14 = arith.constant dense<0.000000e+00> : vector<256xf32>
    %25 = vector.multi_reduction <add>, %24, %cst_14 [0] : vector<32x256xf32> to vector<256xf32>
    %26 = vector.shape_cast %25 : vector<256xf32> to vector<1x256xf32>
    %cst_15 = arith.constant dense<0.000000e+00> : vector<16x256xf32>
    %27 = tpu.matmul %3, %23, %cst_15 {dimension_numbers = #tpu.dot_dimension_numbers<[1], [0], [0], [1], [0, 0, 1, 1], [], []>} : vector<16x32xf32>, vector<32x256xf32>, vector<16x256xf32> -> vector<16x256xf32>
    %cst_16 = arith.constant 2.000000e+00 : f32
    %28 = vector.broadcast %cst_16 : f32 to vector<16x256xf32>
    %29 = arith.mulf %28, %27 : vector<16x256xf32>
    %30 = vector.broadcast %4 : vector<16x1xf32> to vector<16x256xf32>
    %31 = arith.subf %30, %29 : vector<16x256xf32>
    %32 = vector.broadcast %26 : vector<1x256xf32> to vector<16x256xf32>
    %33 = arith.addf %31, %32 : vector<16x256xf32>
    %cst_17 = arith.constant 0.000000e+00 : f32
    %34 = vector.broadcast %cst_17 : f32 to vector<16x256xf32>
    %35 = arith.maximumf %33, %34 : vector<16x256xf32>
    %36 = math.sqrt %35 : vector<16x256xf32>
    %cst_18 = arith.constant 0.000000e+00 : f32
    %37 = vector.broadcast %cst_18 : f32 to vector<16x256xf32>
    %38 = arith.subf %37, %36 : vector<16x256xf32>
    %cst_19 = arith.constant dense<0xFF800000> : vector<256xf32>
    %39 = vector.multi_reduction <maximumf>, %21, %cst_19 [0] : vector<16x256xf32> to vector<256xf32>
    %40 = vector.shape_cast %39 : vector<256xf32> to vector<1x256xf32>
    %41 = vector.broadcast %40 : vector<1x256xf32> to vector<16x256xf32>
    %42 = arith.subf %21, %41 : vector<16x256xf32>
    %cst_20 = arith.constant dense<0xFF800000> : vector<256xf32>
    %43 = vector.multi_reduction <maximumf>, %38, %cst_20 [0] : vector<16x256xf32> to vector<256xf32>
    %44 = vector.shape_cast %43 : vector<256xf32> to vector<1x256xf32>
    %45 = vector.broadcast %44 : vector<1x256xf32> to vector<16x256xf32>
    %46 = arith.subf %38, %45 : vector<16x256xf32>
    %47 = math.exp %42 : vector<16x256xf32>
    %cst_21 = arith.constant dense<0.000000e+00> : vector<256xf32>
    %48 = vector.multi_reduction <add>, %47, %cst_21 [0] : vector<16x256xf32> to vector<256xf32>
    %49 = vector.shape_cast %48 : vector<256xf32> to vector<1x256xf32>
    %50 = math.exp %46 : vector<16x256xf32>
    %cst_22 = arith.constant dense<0.000000e+00> : vector<256xf32>
    %51 = vector.multi_reduction <add>, %50, %cst_22 [0] : vector<16x256xf32> to vector<256xf32>
    %52 = vector.shape_cast %51 : vector<256xf32> to vector<1x256xf32>
    %53 = arith.subf %46, %42 : vector<16x256xf32>
    %54 = arith.mulf %50, %53 : vector<16x256xf32>
    %cst_23 = arith.constant dense<0.000000e+00> : vector<256xf32>
    %55 = vector.multi_reduction <add>, %54, %cst_23 [0] : vector<16x256xf32> to vector<256xf32>
    %56 = vector.shape_cast %55 : vector<256xf32> to vector<1x256xf32>
    %57 = arith.divf %56, %52 : vector<1x256xf32>
    %58 = math.log %49 : vector<1x256xf32>
    %59 = math.log %52 : vector<1x256xf32>
    %60 = arith.subf %58, %59 : vector<1x256xf32>
    %61 = arith.addf %57, %60 : vector<1x256xf32>
    %c0_24 = arith.constant 0 : index
    %c0_25 = arith.constant 0 : index
    %62 = vector.load %arg8[%c0_24, %c0_25] : memref<1x256xf32, #tpu.memory_space<vmem>>, vector<1x256xf32>
    %63 = arith.addf %62, %61 : vector<1x256xf32>
    %c0_26 = arith.constant 0 : index
    %c0_27 = arith.constant 0 : index
    %64 = vector.load %arg8[%c0_26, %c0_27] : memref<1x256xf32, #tpu.memory_space<vmem>>, vector<1x256xf32>
    tpu.vector_store %arg8[%c0_26, %c0_27], %63 {strides = array<i32>} : memref<1x256xf32, #tpu.memory_space<vmem>>, vector<1x256xf32>,
    %c0_i32_28 = arith.constant 0 : i32
    %65 = arith.cmpi eq, %arg2, %c0_i32_28 : i32
    %66 = arith.extui %65 : i1 to i32
    %c0_i32_29 = arith.constant 0 : i32
    %67 = arith.cmpi ne, %66, %c0_i32_29 : i32
    scf.if %67 {
      %c0_30 = arith.constant 0 : index
      %c0_31 = arith.constant 0 : index
      %68 = vector.load %arg8[%c0_30, %c0_31] : memref<1x256xf32, #tpu.memory_space<vmem>>, vector<1x256xf32>
      %c0_32 = arith.constant 0 : index
      %c0_33 = arith.constant 0 : index
      %c0_34 = arith.constant 0 : index
      %69 = vector.load %arg7[%c0_32, %c0_33, %c0_34] : memref<1x1x256xf32, #tpu.memory_space<vmem>>, vector<1x1x256xf32>
      %70 = vector.shape_cast %69 : vector<1x1x256xf32> to vector<1x256xf32>
      %71 = vector.shape_cast %68 : vector<1x256xf32> to vector<1x1x256xf32>
      tpu.vector_store %arg7[%c0_32, %c0_33, %c0_34], %71 {strides = array<i32>} : memref<1x1x256xf32, #tpu.memory_space<vmem>>, vector<1x1x256xf32>,
    } else {
    }
    return
  }
  func.func @transform_0(%arg0: i32, %arg1: i32, %arg2: i32) -> (i32, i32, i32) {
    %c1_i32 = arith.constant 1 : i32
    %0 = arith.muli %arg1, %c1_i32 : i32
    %1 = arith.addi %0, %arg2 : i32
    %c0_i32 = arith.constant 0 : i32
    %c0_i32_0 = arith.constant 0 : i32
    return %arg0, %c0_i32, %1 : i32, i32, i32
  }
  func.func @transform_1(%arg0: i32, %arg1: i32, %arg2: i32) -> (i32, i32, i32) {
    %c1_i32 = arith.constant 1 : i32
    %0 = arith.muli %arg1, %c1_i32 : i32
    %1 = arith.addi %0, %arg2 : i32
    %c0_i32 = arith.constant 0 : i32
    %c0_i32_0 = arith.constant 0 : i32
    return %arg0, %c0_i32, %1 : i32, i32, i32
  }
  func.func @transform_2(%arg0: i32, %arg1: i32, %arg2: i32) -> (i32, i32) {
    %c0_i32 = arith.constant 0 : i32
    %c0_i32_0 = arith.constant 0 : i32
    %c0_i32_1 = arith.constant 0 : i32
    return %c0_i32, %c0_i32_0 : i32, i32
  }
  func.func @transform_3(%arg0: i32, %arg1: i32, %arg2: i32) -> (i32, i32) {
    %c0_i32 = arith.constant 0 : i32
    %c0_i32_0 = arith.constant 0 : i32
    %c0_i32_1 = arith.constant 0 : i32
    return %c0_i32, %c0_i32_0 : i32, i32
  }
  func.func @transform_4(%arg0: i32, %arg1: i32, %arg2: i32) -> (i32, i32, i32) {
    %c1_i32 = arith.constant 1 : i32
    %0 = arith.muli %arg0, %c1_i32 : i32
    %1 = arith.addi %0, %arg1 : i32
    %c0_i32 = arith.constant 0 : i32
    %c0_i32_0 = arith.constant 0 : i32
    %c0_i32_1 = arith.constant 0 : i32
    return %1, %c0_i32, %c0_i32_0 : i32, i32, i32
  }
}

</mosaic_0001>

<bundles_post_ra>
// kernel: tpu_custom_call.1
= control target key start
LH: loop header
LB: loop body
LE: loop exit
PB: predicated region body
PF: predicated region fallthrough
CT: control target
= control target key end

     0   :  { %s1526_s0 = inlined_call_operand.hbm [shape: f32[2,32,256], index: 0, kind: input, shape index: {}]   ;;  %s1527_s1 = inlined_call_operand.hbm [shape: f32[2,32,256], index: 1, kind: input, shape index: {}]   ;;  %s1528_s2 = inlined_call_operand.vmem [shape: f32[16,32], index: 2, kind: input, shape index: {}]   ;;  %s1529_s3 = inlined_call_operand.vmem [shape: f32[16,1], index: 3, kind: input, shape index: {}]   ;;  %s1530_s4 = inlined_call_operand.hbm [shape: f32[2,1,256], index: 4, kind: output, shape index: {}]  }
   0x1   :  { %1532 = sst [smem:[#allocation13_spill]] %s1526_s0 }
   0x2   :  { %9 = vsyncpa [#allocation4], 0 }
   0x3   :  { %11 = vsyncpa [#allocation4 + $0x1], 0 }
   0x4   :  { %12 = vsyncpa [#allocation7], 0 }
   0x5   :  { %14 = vsyncpa [#allocation7 + $0x1], 0 }
   0x6   :  { %15 = vsyncpa [#allocation5], 0 }
   0x7   :  { %17 = vsyncpa [#allocation5 + $0x1], 0  ;;  %s1239_s15 = smov 0   ;;  %s1241_s16 = smov 0  }
   0x8   :  { %s1243_s17 = smov 0   ;;  %s1245_s18 = smov 0  }
   0x9   :  { %s1247_s19 = smov 0   ;;  %s1249_s20 = smov 0  }
   0xa LB: > { %s921_s21 = sadd.s32 4294967295, %s1204_s20   ;;  %s922_s22 = sadd.s32 4294967294, %s1204_s20   ;;  %s1204_s20 = sphi %s1249_s20, %s23_s20   ;;  %s1200_s19 = sphi %s1247_s19, %s1548_s19   ;;  %s1196_s18 = sphi %s1245_s18, %s1547_s18   ;;  %s1192_s17 = sphi %s1243_s17, %s1546_s17   ;;  %s1188_s16 = sphi %s1241_s16, %s1545_s16   ;;  %s1184_s15 = sphi %s1239_s15, %s1544_s15  }
   0xb   : > { %s42_s23 = sadd.s32 1, %s1200_s19  ;;  %s53_s24 = sadd.s32 1, %s1192_s17 }
   0xc   : > { %p44_p0 = scmp.ge.s32.totalorder %s42_s23, 2  ;;  %p60_p1 = scmp.ne.s32.totalorder %s1192_s17, %s1188_s16 }
   0xd   : > { %p61_p2 = scmp.eq.s32.totalorder %s1204_s20, 0  ;;  %p66_p3 = scmp.ne.s32.totalorder %s1188_s16, %s1184_s15 }
   0xe   : > { %s1550_s23 = smov (%p44_p0, %s42_s23), 0  ;;  %p67_p5 = scmp.eq.s32.totalorder %s921_s21, 0 }
   0xf   : > { %1533 = sst [smem:[#allocation12_spill]] %s1550_s23  ;;  %p1280_p4 = por %p61_p2, %p60_p1 }
  0x10   : > { %s48_s26 = ssub.s32 %s1200_s19, %s1550_s23  ;;  %p164_p6 = scmp.eq.s32.totalorder %s921_s21, 1 }
  0x11   : > { %p51_p7 = scmp.eq.s32.totalorder %s48_s26, 0  ;;  %p1286_p8 = por %p67_p5, %p66_p3 }
  0x12   : > { %p1290_p9 = por %p164_p6, %p60_p1  ;;  %p170_p10 = scmp.eq.s32.totalorder %s922_s22, 1 }
  0x13   : > { %s1295_s29 = scalar_select %p51_p7, %s1192_s17, %s53_s24  }
  0x14   : > { %p1297_p11 = por %p170_p10, %p66_p3  ;;  %p924_p12 = scmp.ge.s32.totalorder %s1204_s20, 2 }
  0x15   : > { %p964_p13 = scmp.lt.s32.totalorder %s1204_s20, 2  ;;  %s1304_s5 = sand.u32 1, %s1192_s17  }
  0x16   : > { %s925_s6 = sshll.u32 %s1304_s5, 6  ;;  %s944_s7 = sshll.u32 %s1200_s19, 10 }
  0x17   : > { %s1538_s0 = sld [smem:[#allocation13_spill]]  ;;  %s200_s11 = scalar_lea.vmem [#allocation3], %s925_s6 }
  0x18   : > { %s210_s12 = sshll.u32 %s200_s11, 4  ;;  %p1317_p0 = pnand %p964_p13, %p1280_p4  ;;  %s211_s12 = int_to_ptr.vmem [resolvable:$true] %s210_s12 }
  0x19   : > { %p931_p1 = scmp.ge.s32.totalorder %s1204_s20, 1  ;;  %s197_s14 = scalar_lea.sflag [#allocation4], %s1304_s5 }
  0x1a   : > { %p1066_p2 = pneg %p1317_p0  ;;  %s1077_s21 = scalar_lea.vmem %s211_s12, 1024 }
  0x1b   : > { %p1078_p3 = scmp.ne.s32.totalorder %s211_s12, %s1077_s21  ;;  %s1206_s22 = smov [#allocation3]  }
  0x1c   : > { %s1082_s24 = sshll.u32 %s1206_s22, 4  ;;  %s1083_s24 = int_to_ptr.vmem [resolvable:$false] %s1082_s24 }
  0x1d   : > { %s209_s10 = scalar_lea.hbm %s1538_s0, %s944_s7  ;;  %p1080_p5 = pnand %p1078_p3, %p1066_p2 }
  0x1e   : > { %s1084_s25 = scalar_lea.vmem %s1083_s24, 2048  ;;  %p1085_p4 = scmp.lt.s32.totalorder %s211_s12, %s1083_s24 }
  0x1f   : > { %p1081_p6 = pneg %p1080_p5  ;;  %p1086_p7 = scmp.lt.s32.totalorder %s1084_s25, %s1077_s21 }
  0x21   : > { %p1087_p10 = por %p1086_p7, %p1085_p4 }
  0x23   : > { %p1088_p13 = pnand %p1087_p10, %p1081_p6 }
  0x25   : > { %1091 = shalt.err (!%p1088_p13)
}
  0x26   : > { %s1207_s26 = smov 256   ;;  %s1208_s8 = smov 16  }
  0x27   : > { %956 = dma.hbm_to_vmem [thread:$0]  (!%p1317_p0), %s209_s10, 1024, %s211_s12, %s197_s14, %s1207_s26, %s1207_s26, %s1208_s8  }
  0x28   : > { %p242_p3 = scmp.lt.s32.totalorder %s1204_s20, 3  ;;  %s233_s21 = scalar_lea.hbm %s1527_s1, %s944_s7 }
  0x29   : > { %s224_s24 = scalar_lea.vmem [#allocation6], %s925_s6  ;;  %s221_s0 = scalar_lea.sflag [#allocation7], %s1304_s5 }
  0x2a   : > { %p1338_p5 = pnand %p931_p1, %p242_p3  ;;  %s234_s25 = sshll.u32 %s224_s24, 4  ;;  %s235_s25 = int_to_ptr.vmem [resolvable:$true] %s234_s25 }
  0x2b   : > { %s1105_s23 = scalar_lea.vmem %s235_s25, 1024  ;;  %s1209_s10 = smov [#allocation6]  }
  0x2c   : > { %p1106_p6 = scmp.ne.s32.totalorder %s235_s25, %s1105_s23  ;;  %s1110_s12 = sshll.u32 %s1209_s10, 4  ;;  %s1111_s12 = int_to_ptr.vmem [resolvable:$false] %s1110_s12 }
  0x2d   : > { %s1112_s7 = scalar_lea.vmem %s1111_s12, 2048  ;;  %p1113_p10 = scmp.lt.s32.totalorder %s235_s25, %s1111_s12 }
  0x2e   : > { %p1108_p4 = pnand %p1106_p6, %p1066_p2  ;;  %p1114_p1 = scmp.lt.s32.totalorder %s1112_s7, %s1105_s23 }
  0x30   : > { %p1109_p7 = pneg %p1108_p4  ;;  %p1115_p13 = por %p1114_p1, %p1113_p10 }
  0x32   : > { %p1116_p3 = pnand %p1115_p13, %p1109_p7 }
  0x34   : > { %1119 = shalt.err (!%p1116_p3)
}
  0x35   : > { %959 = dma.hbm_to_vmem [thread:$0]  (!%p1317_p0), %s233_s21, 1024, %s235_s25, %s221_s0, %s1207_s26, %s1207_s26, %s1208_s8  }
  0x36   : > { %246 = sbr.rel (%p1338_p5) target bundleno = 401 (0x191), region = 36  ;;  %s1353_s5 = sand.u32 (!%p1338_p5), 1, %s1188_s16  }
  0x37   : > { %s932_s6 = sshll.u32 (!%p1338_p5), %s1353_s5, 6  ;;  %s249_s14 = scalar_lea.sflag (!%p1338_p5), [#allocation4], %s1353_s5 }
  0x38   : > { %s1357_s9 = scalar_lea.vmem (!%p1338_p5), [#allocation3], %s932_s6 }
  0x3b   : > { %1171 = dma.done.wait (%p1286_p8), %s249_s14, 1024  }
  0x3c   : > { %1173 = vsyncadd (%p1286_p8), %s249_s14, 4294966272  ;;  %s258_s0 = scalar_lea.sflag [#allocation7], %s1353_s5  ;;  %s1364_s23 = scalar_lea.vmem [#allocation6], %s932_s6 }
  0x3d   : > { %1175 = dma.done.wait (%p1286_p8), %s258_s0, 1024  }
  0x3e   : > { %1177 = vsyncadd (%p1286_p8), %s258_s0, 4294966272  ;;  %v1210_v0 = vmov 0.0   ;;  %v1211_v1 = vmov 0   ;;  %v316_v2 = vld [vmem:[%s1357_s9 + $0x38] sm:$0xff]  ;;  %v315_v4 = vld [vmem:[%s1357_s9 + $0x30] sm:$0xff]  ;;  %vm343_vm0 = vcmask 261120   ;;  %v300_v50 = vlaneseq }
  0x3f   : > { %414 = vmatprep.mubr.f32.mxu0 %v1210_v0  ;;  %583 = vmatprep.mubr.f32.mxu1 %v1210_v0  ;;  %v492_v3 = vld [vmem:[%s1364_s23 + $0x38] sm:$0xff]  ;;  %v491_v5 = vld [vmem:[%s1364_s23 + $0x30] sm:$0xff]  ;;  %v314_v6 = vld [vmem:[%s1357_s9 + $0x28] sm:$0xff]  ;;  %v324_v8 = vmul.f32 %v316_v2, %v316_v2  ;;  %v323_v30 = vmul.f32 %v315_v4, %v315_v4  ;;  %s934_s25 = sshll.u32 %s1353_s5, 1  ;;  %s946_s10 = sshll.u32 %s1196_s18, 5 }
  0x40   : > { %1019 = vset.pattern.permute.xlu0 %v1211_v1  ;;  %374 = vmatprep.subr.mxu0 %v316_v2  ;;  %v490_v7 = vld [vmem:[%s1364_s23 + $0x28] sm:$0xff]  ;;  %v500_v9 = vmul.f32 %v492_v3, %v492_v3  ;;  %v322_v10 = vmul.f32 %v314_v6, %v314_v6  ;;  %v313_v11 = vld [vmem:[%s1357_s9 + $0x20] sm:$0xff]  ;;  %v312_v13 = vld [vmem:[%s1357_s9 + $0x18] sm:$0xff]  ;;  %v499_v37 = vmul.f32 %v491_v5, %v491_v5  ;;  %vm1407_vm1 = vcmp.lt.s32.totalorder %v300_v50, 256  ;;  %s290_s12 = scalar_lea.vmem [#allocation8], %s934_s25  ;;  %s793_s0 = scalar_lea.sflag [#allocation5], %s1353_s5 }
  0x41   : > { %543 = vmatprep.subr.mxu1 %v492_v3  ;;  %375 = vmatpush1.msra.mxu0 %v315_v4  ;;  %v489_v12 = vld [vmem:[%s1364_s23 + $0x20] sm:$0xff]  ;;  %v498_v14 = vmul.f32 %v490_v7, %v490_v7  ;;  %v321_v15 = vmul.f32 %v313_v11, %v313_v11  ;;  %v320_v16 = vmul.f32 %v312_v13, %v312_v13  ;;  %v488_v17 = vld [vmem:[%s1364_s23 + $0x18] sm:$0xff]  ;;  %v311_v18 = vld [vmem:[%s1357_s9 + $0x10] sm:$0xff]  ;;  %s808_s7 = sshll.u32 %s290_s12, 4  ;;  %s1213_s27 = smov [#allocation8]   ;;  %s809_s7 = int_to_ptr.vmem [resolvable:$true] %s808_s7 }
  0x42   : > { %544 = vmatpush1.msra.mxu1 %v491_v5  ;;  %376 = vmatprep.subr.mxu0 %v314_v6  ;;  %v487_v19 = vld [vmem:[%s1364_s23 + $0x10] sm:$0xff]  ;;  %v496_v20 = vmul.f32 %v488_v17, %v488_v17  ;;  %v319_v21 = vmul.f32 %v311_v18, %v311_v18  ;;  %v310_v23 = vld [vmem:[%s1357_s9 + $0x8] sm:$0xff]  ;;  %v309_v25 = vld [vmem:[%s1357_s9] sm:$0xff]  ;;  %v497_v31 = vmul.f32 %v489_v12, %v489_v12  ;;  %s1482_s9 = scalar_lea.hbm %s1530_s4, %s946_s10  ;;  %s1124_s18 = sshll.u32 %s1213_s27, 4  ;;  %s1125_s18 = int_to_ptr.vmem [resolvable:$false] %s1124_s18 }
  0x43   : > { %545 = vmatprep.subr.mxu1 %v490_v7  ;;  %377 = vmatpush1.msra.mxu0 %v313_v11  ;;  %v495_v22 = vmul.f32 %v487_v19, %v487_v19  ;;  %v486_v24 = vld [vmem:[%s1364_s23 + $0x8] sm:$0xff]  ;;  %v318_v26 = vmul.f32 %v310_v23, %v310_v23  ;;  %v317_v28 = vmul.f32 %v309_v25, %v309_v25  ;;  %v485_v29 = vld [vmem:[%s1364_s23] sm:$0xff]  ;;  %s1120_s23 = scalar_lea.vmem %s809_s7, 32  ;;  %s1126_s13 = scalar_lea.vmem %s1125_s18, 64 }
  0x44   : > { %546 = vmatpush1.msra.mxu1 %v489_v12  ;;  %378 = vmatprep.subr.mxu0 %v312_v13  ;;  %v494_v27 = vmul.f32 %v486_v24, %v486_v24  ;;  %v493_v32 = vmul.f32 %v485_v29, %v485_v29  ;;  %v305_v33 = vld [vmem:[%s1528_s2] sm:$0xff]  ;;  %v306_v44 = vld [vmem:[%s1528_s2 + $0x8] sm:$0xff]  ;;  %304 = vst.msk [vmem:[#allocation2] sm:$0x3] %vm1407_vm1, %v1210_v0  ;;  %p1121_p8 = scmp.ne.s32.totalorder %s809_s7, %s1120_s23  ;;  %p1127_p5 = scmp.lt.s32.totalorder %s809_s7, %s1125_s18 }
  0x45   : > { %547 = vmatprep.subr.mxu1 %v488_v17  ;;  %379 = vmatpush1.msra.mxu0 %v311_v18  ;;  %v334_v34 = vadd.f32 %v320_v16, %v318_v26  ;;  %v325_v36 = vadd.f32 %v319_v21, %v317_v28  ;;  %v307_v39 = vld [vmem:[%s1529_s3] sm:$0xff]  ;;  %v308_v49 = vld [vmem:[%s1529_s3 + $0x8] sm:$0xff]  ;;  %p1128_p6 = scmp.lt.s32.totalorder %s1126_s13, %s1120_s23 }
  0x46   : > { %548 = vmatpush1.msra.mxu1 %v487_v19  ;;  %380 = vmatprep.subr.mxu0 %v310_v23  ;;  %v510_v35 = vadd.f32 %v496_v20, %v494_v27  ;;  %v501_v38 = vadd.f32 %v495_v22, %v493_v32  ;;  %p1122_p0 = pnand %p1121_p8, %p1290_p9 }
  0x47   : > { %549 = vmatprep.subr.mxu1 %v486_v24  ;;  %381 = vmatpush1.msra.mxu0 %v309_v25  ;;  %v335_v40 = vadd.f32 %v334_v34, %v322_v10  ;;  %v326_v42 = vadd.f32 %v325_v36, %v321_v15  ;;  %p1129_p4 = por %p1128_p6, %p1127_p5 }
  0x48   : > { %550 = vmatpush1.msra.mxu1 %v485_v29  ;;  %v511_v41 = vadd.f32 %v510_v35, %v498_v14  ;;  %935 = vmatmul.mubr.msk.f32.vlgmr.msra.gmra.mxu0 %vm343_vm0, %v305_v33  ;;  %v502_v43 = vadd.f32 %v501_v38, %v497_v31  ;;  %p1123_p2 = pneg %p1122_p0 }
  0x49   : > { %937 = vmatmul.mubr.msk.f32.vlgmr.msra.gmra.mxu1 %vm343_vm0, %v305_v33  ;;  %420 = vmatprep.mubr.f32.mxu0 %v1210_v0  ;;  %v336_v45 = vadd.f32 %v335_v40, %v324_v8  ;;  %v327_v47 = vadd.f32 %v326_v42, %v323_v30 }
  0x4a   : > { %589 = vmatprep.mubr.f32.mxu1 %v1210_v0  ;;  %v512_v46 = vadd.f32 %v511_v41, %v500_v9  ;;  %433 = vperm.xlu0 %1019, %v307_v39   ;;  %v503_v48 = vadd.f32 %v502_v43, %v499_v37  ;;  %p1130_p7 = pnand %p1129_p4, %p1123_p2 }
  0x4b   : > { %v328_v52 = vrot.slane %v327_v47, 4  ;;  %v337_v54 = vrot.slane %v336_v45, 4 }
  0x4c   : > { %936 = vmatmul.mubr.msk.f32.gmra.mxu0 %vm343_vm0, %v306_v44  ;;  %v504_v53 = vrot.slane %v503_v48, 4  ;;  %v513_v55 = vrot.slane %v512_v46, 4 }
  0x4d   : > { %938 = vmatmul.mubr.msk.f32.gmra.mxu1 %vm343_vm0, %v306_v44  ;;  %v329_v56 = vadd.f32 %v328_v52, %v327_v47  ;;  %v338_v58 = vadd.f32 %v337_v54, %v336_v45 }
  0x4e   : > { %438 = vperm.xlu0 %1019, %v308_v49   ;;  %v505_v57 = vadd.f32 %v504_v53, %v503_v48  ;;  %v514_v59 = vadd.f32 %v513_v55, %v512_v46 }
  0x4f   : > { %v330_v60 = vrot.slane %v329_v56, 2  ;;  %v339_v62 = vrot.slane %v338_v58, 2 }
  0x50   : > { %v506_v61 = vrot.slane %v505_v57, 2  ;;  %v515_v63 = vrot.slane %v514_v59, 2 }
  0x51   : > { %v331_v1 = vadd.f32 %v330_v60, %v329_v56  ;;  %v340_v3 = vadd.f32 %v339_v62, %v338_v58 }
  0x52   : > { %v507_v2 = vadd.f32 %v506_v61, %v505_v57  ;;  %v516_v4 = vadd.f32 %v515_v63, %v514_v59 }
  0x53   : > { %v332_v5 = vrot.slane %v331_v1, 1  ;;  %v341_v7 = vrot.slane %v340_v3, 1 }
  0x54   : > { %v508_v6 = vrot.slane %v507_v2, 1  ;;  %v517_v0 = vrot.slane %v516_v4, 1 }
  0x55   : > { %v333_v11 = vadd.f32 %v332_v5, %v331_v1  ;;  %v342_v15 = vadd.f32 %v341_v7, %v340_v3 }
  0x56   : > { %v509_v13 = vadd.f32 %v508_v6, %v507_v2  ;;  %v518_v17 = vadd.f32 %v517_v0, %v516_v4 }
  0xc5   : > { %v434_v10 = vpop.permute.xlu0 %433 }
  0xc9   : > { %v439_v37 = vpop.permute.xlu0 %438 }
 0x108   : > { %v416_v8 = vpop.f32.mrf.mxu0 }
 0x109   : > { %v585_v9 = vpop.f32.mrf.mxu1  ;;  %v427_v12 = vmul.f32 2.0, %v416_v8 }
 0x10a   : > { %v596_v14 = vmul.f32 2.0, %v585_v9  ;;  %v418_v16 = vpop.f32.mrf.mxu0 }
 0x10b   : > { %v587_v18 = vpop.f32.mrf.mxu1  ;;  %v441_v19 = vsub.f32 %v434_v10, %v427_v12  ;;  %v428_v21 = vmul.f32 2.0, %v418_v16 }
 0x10c   : > { %v600_v20 = vsub.f32 %v434_v10, %v596_v14  ;;  %v597_v22 = vmul.f32 2.0, %v587_v18  ;;  %v422_v23 = vpop.f32.mrf.mxu0 }
 0x10d   : > { %v591_v24 = vpop.f32.mrf.mxu1  ;;  %v445_v25 = vadd.f32 %v441_v19, %v333_v11  ;;  %v442_v27 = vsub.f32 %v434_v10, %v428_v21  ;;  %v429_v29 = vmul.f32 2.0, %v422_v23 }
 0x10e   : > { %v604_v26 = vadd.f32 %v600_v20, %v509_v13  ;;  %v601_v28 = vsub.f32 %v434_v10, %v597_v22  ;;  %v598_v30 = vmul.f32 2.0, %v591_v24  ;;  %v424_v31 = vpop.f32.mrf.mxu0 }
 0x10f   : > { %v593_v32 = vpop.f32.mrf.mxu1  ;;  %v449_v33 = vmax.f32 %v445_v25, 0.0  ;;  %v446_v35 = vadd.f32 %v442_v27, %v342_v15  ;;  %v443_v38 = vsub.f32 %v439_v37, %v429_v29  ;;  %v430_v40 = vmul.f32 2.0, %v424_v31 }
 0x110   : > { %v1414_v34 = vmax.f32 %v604_v26, 0.0  ;;  %v605_v36 = vadd.f32 %v601_v28, %v518_v17  ;;  %v602_v39 = vsub.f32 %v439_v37, %v598_v30  ;;  %v599_v41 = vmul.f32 2.0, %v593_v32 }
 0x111   : > { %1020 = vrsqrt.f32 %v449_v33  ;;  %v1417_v42 = vmax.f32 %v446_v35, 0.0  ;;  %v447_v44 = vadd.f32 %v443_v38, %v333_v11  ;;  %v444_v46 = vsub.f32 %v439_v37, %v430_v40 }
 0x112   : > { %1022 = vrsqrt.f32 %v1414_v34  ;;  %v1419_v43 = vmax.f32 %v605_v36, 0.0  ;;  %v606_v45 = vadd.f32 %v602_v39, %v509_v13  ;;  %v603_v47 = vsub.f32 %v439_v37, %v599_v41 }
 0x113   : > { %1024 = vrsqrt.f32 %v1417_v42  ;;  %v451_v48 = vmax.f32 %v447_v44, 0.0  ;;  %v448_v52 = vadd.f32 %v444_v46, %v342_v15  ;;  %vm455_vm2 = vcmp.eq.f32.partialorder %v449_v33, inf }
 0x114   : > { %1026 = vrsqrt.f32 %v1419_v43  ;;  %v610_v49 = vmax.f32 %v606_v45, 0.0  ;;  %v607_v53 = vadd.f32 %v603_v47, %v518_v17  ;;  %vm457_vm3 = vcmp.eq.f32.partialorder %v449_v33, 0.0 }
 0x115   : > { %1028 = vrsqrt.f32 %v451_v48  ;;  %v1423_v54 = vmax.f32 %v448_v52, 0.0  ;;  %v458_v60 = vand.u32 2147483648, %v449_v33  ;;  %vm614_vm4 = vcmp.eq.f32.partialorder %v1414_v34, inf }
 0x116   : > { %1030 = vrsqrt.f32 %v610_v49  ;;  %v1425_v55 = vmax.f32 %v607_v53, 0.0  ;;  %vm616_vm5 = vcmp.eq.f32.partialorder %v1414_v34, 0.0  ;;  %v617_v63 = vand.u32 2147483648, %v1414_v34 }
 0x117   : > { %1032 = vrsqrt.f32 %v1423_v54  ;;  %vm462_vm6 = vcmp.eq.f32.partialorder %v1417_v42, inf  ;;  %vm464_vm7 = vcmp.eq.f32.partialorder %v1417_v42, 0.0  ;;  %v465_v1 = vand.u32 2147483648, %v1417_v42 }
 0x118   : > { %1034 = vrsqrt.f32 %v1425_v55  ;;  %vm621_vm8 = vcmp.eq.f32.partialorder %v1419_v43, inf  ;;  %vm623_vm9 = vcmp.eq.f32.partialorder %v1419_v43, 0.0  ;;  %v624_v4 = vand.u32 2147483648, %v1419_v43 }
 0x119   : > { %vm469_vm10 = vcmp.eq.f32.partialorder %v451_v48, inf  ;;  %vm471_vm11 = vcmp.eq.f32.partialorder %v451_v48, 0.0  ;;  %v472_v0 = vand.u32 2147483648, %v451_v48  ;;  %vm628_vm12 = vcmp.eq.f32.partialorder %v610_v49, inf }
 0x11a   : > { %vm630_vm13 = vcmp.eq.f32.partialorder %v610_v49, 0.0  ;;  %v631_v10 = vand.u32 2147483648, %v610_v49  ;;  %vm476_vm14 = vcmp.eq.f32.partialorder %v1423_v54, inf  ;;  %vm478_vm15 = vcmp.eq.f32.partialorder %v1423_v54, 0.0 }
 0x11b   : > { %v479_v16 = vand.u32 2147483648, %v1423_v54  ;;  %vm635_vm0 = vcmp.eq.f32.partialorder %v1425_v55, inf }
 0x11e   : > { %v1021_v56 = vpop.eup %1020 }
 0x11f   : > { %v1023_v57 = vpop.eup %1022  ;;  %v454_v58 = vmul.f32 %v1021_v56, %v449_v33 }
 0x120   : > { %v1025_v59 = vpop.eup %1024  ;;  %v613_v61 = vmul.f32 %v1023_v57, %v1414_v34 }
 0x121   : > { %v1027_v62 = vpop.eup %1026  ;;  %v456_v2 = vsel %vm455_vm2, %v449_v33, %v454_v58  ;;  %v461_v3 = vmul.f32 %v1025_v59, %v1417_v42  ;;  %v638_v33 = vand.u32 2147483648, %v1425_v55  ;;  %vm637_vm2 = vcmp.eq.f32.partialorder %v1425_v55, 0.0 }
 0x122   : > { %v1029_v5 = vpop.eup %1028  ;;  %v615_v6 = vsel %vm614_vm4, %v1414_v34, %v613_v61  ;;  %v620_v7 = vmul.f32 %v1027_v62, %v1419_v43  ;;  %v459_v11 = vsel %vm457_vm3, %v458_v60, %v456_v2 }
 0x123   : > { %v1031_v8 = vpop.eup %1030  ;;  %v468_v9 = vmul.f32 %v1029_v5, %v451_v48  ;;  %v618_v13 = vsel %vm616_vm5, %v617_v63, %v615_v6  ;;  %v463_v14 = vsel %vm462_vm6, %v1417_v42, %v461_v3  ;;  %v481_v22 = vsub.f32 0.0, %v459_v11 }
 0x124   : > { %v627_v12 = vmul.f32 %v1031_v8, %v610_v49  ;;  %v1033_v17 = vpop.eup %1032  ;;  %v622_v18 = vsel %vm621_vm8, %v1419_v43, %v620_v7  ;;  %v640_v26 = vsub.f32 0.0, %v618_v13  ;;  %v466_v27 = vsel %vm464_vm7, %v465_v1, %v463_v14 }
 0x125   : > { %v470_v15 = vsel %vm469_vm10, %v451_v48, %v468_v9  ;;  %v1035_v21 = vpop.eup %1034  ;;  %v475_v25 = vmul.f32 %v1033_v17, %v1423_v54  ;;  %v625_v30 = vsel %vm623_vm9, %v624_v4, %v622_v18  ;;  %v482_v37 = vsub.f32 0.0, %v466_v27 }
 0x126   : > { %v473_v19 = vsel %vm471_vm11, %v472_v0, %v470_v15  ;;  %v629_v20 = vsel %vm628_vm12, %v610_v49, %v627_v12  ;;  %v634_v29 = vmul.f32 %v1035_v21, %v1425_v55  ;;  %v641_v41 = vsub.f32 0.0, %v625_v30 }
 0x127   : > { %v483_v23 = vsub.f32 0.0, %v473_v19  ;;  %v632_v24 = vsel %vm630_vm13, %v631_v10, %v629_v20  ;;  %v477_v32 = vsel %vm476_vm14, %v1423_v54, %v475_v25 }
 0x128   : > { %v642_v28 = vsub.f32 0.0, %v632_v24  ;;  %v480_v35 = vsel %vm478_vm15, %v479_v16, %v477_v32  ;;  %v636_v36 = vsel %vm635_vm0, %v1425_v55, %v634_v29 }
 0x129   : > { %v644_v31 = vmax.f32 %v481_v22, %v483_v23  ;;  %v484_v39 = vsub.f32 0.0, %v480_v35  ;;  %v639_v40 = vsel %vm637_vm2, %v638_v33, %v636_v36 }
 0x12a   : > { %v662_v34 = vmax.f32 %v640_v26, %v642_v28  ;;  %v643_v43 = vsub.f32 0.0, %v639_v40 }
 0x12b   : > { %v645_v38 = vrot.slane %v644_v31, 4  ;;  %v651_v45 = vmax.f32 %v482_v37, %v484_v39 }
 0x12c   : > { %v663_v42 = vrot.slane %v662_v34, 4  ;;  %v669_v47 = vmax.f32 %v641_v41, %v643_v43 }
 0x12d   : > { %v646_v44 = vmax.f32 %v644_v31, %v645_v38  ;;  %v652_v49 = vrot.slane %v651_v45, 4 }
 0x12e   : > { %v664_v46 = vmax.f32 %v662_v34, %v663_v42  ;;  %v670_v53 = vrot.slane %v669_v47, 4 }
 0x12f   : > { %v647_v48 = vrot.slane %v646_v44, 2  ;;  %v653_v56 = vmax.f32 %v651_v45, %v652_v49 }
 0x130   : > { %v665_v52 = vrot.slane %v664_v46, 2  ;;  %v671_v58 = vmax.f32 %v669_v47, %v670_v53 }
 0x131   : > { %v648_v54 = vmax.f32 %v646_v44, %v647_v48  ;;  %v654_v59 = vrot.slane %v653_v56, 2 }
 0x132   : > { %v666_v57 = vmax.f32 %v664_v46, %v665_v52  ;;  %v672_v61 = vrot.slane %v671_v58, 2 }
 0x133   : > { %v649_v55 = vrot.slane %v648_v54, 1  ;;  %v655_v63 = vmax.f32 %v653_v56, %v654_v59 }
 0x134   : > { %v667_v60 = vrot.slane %v666_v57, 1  ;;  %v673_v2 = vmax.f32 %v671_v58, %v672_v61 }
 0x135   : > { %v650_v62 = vmax.f32 %v648_v54, %v649_v55  ;;  %v656_v5 = vrot.slane %v655_v63, 1 }
 0x136   : > { %v668_v1 = vmax.f32 %v666_v57, %v667_v60  ;;  %v674_v0 = vrot.slane %v673_v2, 1 }
 0x137   : > { %v658_v3 = vsub.f32 %v481_v22, %v650_v62  ;;  %v660_v4 = vsub.f32 %v483_v23, %v650_v62  ;;  %v657_v10 = vmax.f32 %v655_v63, %v656_v5 }
 0x138   : > { %v676_v6 = vsub.f32 %v640_v26, %v668_v1  ;;  %v678_v7 = vsub.f32 %v642_v28, %v668_v1  ;;  %v675_v17 = vmax.f32 %v673_v2, %v674_v0 }
 0x139   : > { %v680_v8 = vmul.f32 1.442695, %v658_v3  ;;  %v684_v9 = vmul.f32 1.442695, %v660_v4  ;;  %v659_v15 = vsub.f32 %v482_v37, %v657_v10  ;;  %v661_v16 = vsub.f32 %v484_v39, %v657_v10 }
 0x13a   : > { %v702_v11 = vmul.f32 1.442695, %v676_v6  ;;  %v706_v12 = vmul.f32 1.442695, %v678_v7  ;;  %v724_v13 = vsub.f32 %v676_v6, %v658_v3  ;;  %v726_v14 = vsub.f32 %v678_v7, %v660_v4 }
 0x13b   : > { %1036 = vpow2.f32 %v680_v8  ;;  %v682_v18 = vmul.f32 1.442695, %v659_v15  ;;  %v686_v19 = vmul.f32 1.442695, %v661_v16  ;;  %v677_v20 = vsub.f32 %v641_v41, %v675_v17 }
 0x13c   : > { %1038 = vpow2.f32 %v684_v9  ;;  %v679_v21 = vsub.f32 %v643_v43, %v675_v17 }
 0x13d   : > { %1040 = vpow2.f32 %v702_v11  ;;  %v704_v22 = vmul.f32 1.442695, %v677_v20  ;;  %v725_v23 = vsub.f32 %v677_v20, %v659_v15 }
 0x13e   : > { %1042 = vpow2.f32 %v706_v12  ;;  %v708_v24 = vmul.f32 1.442695, %v679_v21  ;;  %v727_v25 = vsub.f32 %v679_v21, %v661_v16 }
 0x13f   : > { %1044 = vpow2.f32 %v682_v18 }
 0x140   : > { %1046 = vpow2.f32 %v686_v19 }
 0x141   : > { %1048 = vpow2.f32 %v704_v22 }
 0x142   : > { %1050 = vpow2.f32 %v708_v24  ;;  %v1212_v24 = vmov 1966171168  }
 0x148   : > { %v1037_v26 = vpop.eup %1036 }
 0x149   : > { %v1039_v27 = vpop.eup %1038 }
 0x14a   : > { %v1041_v28 = vpop.eup %1040  ;;  %v688_v29 = vadd.f32 %v1039_v27, %v1037_v26 }
 0x14b   : > { %v1043_v30 = vpop.eup %1042  ;;  %v728_v31 = vmul.f32 %v1041_v28, %v724_v13 }
 0x14c   : > { %v1045_v32 = vpop.eup %1044  ;;  %v730_v33 = vmul.f32 %v1043_v30, %v726_v14  ;;  %v689_v34 = vrot.slane %v688_v29, 4  ;;  %v710_v35 = vadd.f32 %v1043_v30, %v1041_v28 }
 0x14d   : > { %v1047_v36 = vpop.eup %1046 }
 0x14e   : > { %v1049_v37 = vpop.eup %1048  ;;  %v690_v38 = vadd.f32 %v689_v34, %v688_v29  ;;  %v695_v39 = vadd.f32 %v1047_v36, %v1045_v32  ;;  %v711_v40 = vrot.slane %v710_v35, 4  ;;  %v732_v41 = vadd.f32 %v730_v33, %v728_v31 }
 0x14f   : > { %v1051_v42 = vpop.eup %1050  ;;  %v729_v43 = vmul.f32 %v1049_v37, %v725_v23 }
 0x150   : > { %v731_v44 = vmul.f32 %v1051_v42, %v727_v25  ;;  %v691_v45 = vrot.slane %v690_v38, 2  ;;  %v696_v46 = vrot.slane %v695_v39, 4  ;;  %v712_v47 = vadd.f32 %v711_v40, %v710_v35 }
 0x151   : > { %v717_v48 = vadd.f32 %v1051_v42, %v1049_v37  ;;  %v733_v49 = vrot.slane %v732_v41, 4  ;;  %v767_v25 = vunpack.c.l.s4 %v1212_v24  ;;  %v770_v35 = vshrl.u32 %v300_v50, 7 }
 0x152   : > { %v692_v52 = vadd.f32 %v691_v45, %v690_v38  ;;  %v697_v53 = vadd.f32 %v696_v46, %v695_v39  ;;  %v713_v54 = vrot.slane %v712_v47, 2  ;;  %v739_v56 = vadd.f32 %v731_v44, %v729_v43 }
 0x153   : > { %v718_v57 = vrot.slane %v717_v48, 4  ;;  %v734_v1 = vadd.f32 %v733_v49, %v732_v41  ;;  %v768_v34 = vunpack.c.0.s8 %v767_v25  ;;  %v762_v41 = vld [vmem:[#allocation2] sm:$0x3] }
 0x154   : > { %v693_v58 = vrot.slane %v692_v52, 1  ;;  %v698_v55 = vrot.slane %v697_v53, 2  ;;  %v714_v59 = vadd.f32 %v713_v54, %v712_v47  ;;  %v740_v3 = vrot.slane %v739_v56, 4 }
 0x155   : > { %v719_v60 = vadd.f32 %v718_v57, %v717_v48  ;;  %v735_v0 = vrot.slane %v734_v1, 2  ;;  %v771_v38 = vsub.s32 %v768_v34, %v770_v35 }
 0x156   : > { %v694_v61 = vadd.f32 %v693_v58, %v692_v52  ;;  %v699_v62 = vadd.f32 %v698_v55, %v697_v53  ;;  %v715_v63 = vrot.slane %v714_v59, 1  ;;  %v741_v9 = vadd.f32 %v740_v3, %v739_v56 }
 0x157   : > { %v720_v2 = vrot.slane %v719_v60, 2  ;;  %v736_v11 = vadd.f32 %v735_v0, %v734_v1 }
 0x158   : > { %v700_v4 = vrot.slane %v699_v62, 1  ;;  %v716_v5 = vadd.f32 %v715_v63, %v714_v59  ;;  %1052 = vlog2.f32 %v694_v61  ;;  %v742_v12 = vrot.slane %v741_v9, 2 }
 0x159   : > { %v721_v6 = vadd.f32 %v720_v2, %v719_v60  ;;  %v737_v13 = vrot.slane %v736_v11, 1 }
 0x15a   : > { %v701_v7 = vadd.f32 %v700_v4, %v699_v62  ;;  %1054 = vrcp.f32 %v716_v5  ;;  %v743_v14 = vadd.f32 %v742_v12, %v741_v9 }
 0x15b   : > { %v722_v8 = vrot.slane %v721_v6, 1  ;;  %1056 = vlog2.f32 %v716_v5  ;;  %v738_v16 = vadd.f32 %v737_v13, %v736_v11 }
 0x15c   : > { %1058 = vlog2.f32 %v701_v7  ;;  %v744_v18 = vrot.slane %v743_v14, 1 }
 0x15d   : > { %v723_v10 = vadd.f32 %v722_v8, %v721_v6 }
 0x15e   : > { %v745_v26 = vadd.f32 %v744_v18, %v743_v14 }
 0x15f   : > { %1060 = vrcp.f32 %v723_v10 }
 0x160   : > { %1062 = vlog2.f32 %v723_v10 }
 0x165   : > { %v1053_v15 = vpop.eup %1052 }
 0x166   : > { %v751_v19 = vmul.f32 0.6931472, %v1053_v15 }
 0x167   : > { %v1055_v17 = vpop.eup %1054 }
 0x168   : > { %v1057_v20 = vpop.eup %1056  ;;  %v747_v21 = vmul.f32 %v1055_v17, %v738_v16 }
 0x169   : > { %v1059_v22 = vpop.eup %1058  ;;  %v755_v23 = vmul.f32 0.6931472, %v1057_v20 }
 0x16a   : > { %v753_v29 = vmul.f32 0.6931472, %v1059_v22 }
 0x16b   : > { %v758_v27 = vsub.f32 %v751_v19, %v755_v23 }
 0x16c   : > { %v1061_v28 = vpop.eup %1060 }
 0x16d   : > { %v1063_v30 = vpop.eup %1062  ;;  %v749_v31 = vmul.f32 %v1061_v28, %v745_v26  ;;  %v760_v32 = vadd.f32 %v758_v27, %v747_v21 }
 0x16e   : > { %v757_v33 = vmul.f32 0.6931472, %v1063_v30 }
 0x170   : > { %v759_v36 = vsub.f32 %v753_v29, %v757_v33 }
 0x172   : > { %v761_v37 = vadd.f32 %v759_v36, %v749_v31 }
 0x174   : > { %v765_v39 = vcombine.low %v760_v32, %v761_v37 }
 0x176   : > { %v772_v40 = vrot.slane %v765_v39, %v771_v38 }
 0x178   : > { %v779_v42 = vrot.slane %v772_v40, %v771_v38 }
 0x17a   : > { %v781_v43 = vadd.f32 %v779_v42, %v762_v41 }
 0x17c   : > { %786 = vst.msk [vmem:[#allocation2] sm:$0x3] %vm1407_vm1, %v781_v43 }
 0x183   : > { %v790_v50 = vld [vmem:[#allocation2] sm:$0x3] }
 0x184   : > { %791 = vst.msk [vmem:[%s290_s12] sm:$0x3] %vm1407_vm1, %v790_v50 }
 0x185   : > { %1133 = shalt.err (!%p1130_p7)
}
 0x186   : > { %s1134_s26 = scalar_lea.hbm %s1482_s9, 32  ;;  %s1138_s11 = scalar_lea.hbm %s1530_s4, 64 }
 0x187   : > { %p1135_p10 = scmp.ne.s32.totalorder %s1482_s9, %s1134_s26  ;;  %p1139_p3 = scmp.lt.s32.totalorder %s1482_s9, %s1530_s4 }
 0x188   : > { %p1140_p8 = scmp.lt.s32.totalorder %s1138_s11, %s1134_s26 }
 0x189   : > { %p1136_p1 = pnand %p1135_p10, %p1290_p9 }
 0x18a   : > { %p1141_p0 = por %p1140_p8, %p1139_p3 }
 0x18b   : > { %p1137_p13 = pneg %p1136_p1 }
 0x18d   : > { %p1142_p2 = pnand %p1141_p0, %p1137_p13 }
 0x18f   : > { %1145 = shalt.err (!%p1142_p2)
}
 0x190   : > { %951 = dma.vmem_to_hbm [thread:$0]  (%p1290_p9), %s809_s7, 32, %s1482_s9, %s793_s0  }
 0x191 PF: > { %s820_s24 = sand.u32 1, %s1184_s15   ;;  %p961_p5 = pnand %p924_p12, %p1297_p11 }
 0x192   : > { %s821_s25 = scalar_lea.sflag [#allocation5], %s820_s24 }
 0x193   : > { %p962_p6 = pneg %p961_p5 }
 0x195   : > { %1179 = dma.done.wait (%p962_p6), %s821_s25, 32  }
 0x196   : > { %1181 = vsyncadd (%p962_p6), %s821_s25, 4294967264  ;;  %s23_s20 = sadd.s32 1, %s1204_s20   ;;  %s1543_s28 = sld [smem:[#allocation12_spill]] }
 0x197   : > { %p20_p4 = scmp.ge.s32.totalorder %s23_s20, 4   ;;  %s1544_s15 = smov %s1188_s16 }
 0x198   : > { %s1545_s16 = smov %s1192_s17  ;;  %s1546_s17 = smov %s1295_s29 }
 0x199   : > { %s1547_s18 = smov %s1200_s19  ;;  %22 = sbr.rel (!%p20_p4) target bundleno = 10 (0xa), region = 102 }
 0x19c   : > { %s1548_s19 = smov %s1543_s28 }
 0x19e   :  { %826 = vsyncpa [#allocation4], 1 }
 0x19f   :  { %828 = vsyncpa [#allocation4 + $0x1], 1 }
 0x1a0   :  { %829 = vsyncpa [#allocation7], 1 }
 0x1a1   :  { %831 = vsyncpa [#allocation7 + $0x1], 1 }
 0x1a2   :  { %832 = vsyncpa [#allocation5], 1 }
 0x1a3   :  { %834 = vsyncpa [#allocation5 + $0x1], 1 }

</bundles_post_ra>
